<compile_context>
chip_gen: v5e
topology: v5e:2x2
jax: 0.10.0
libtpu: 0.0.40
codegen_flags: <defaults>
</compile_context>

<pallas_src>
import functools

import jax
import jax.numpy as jnp
from jax.experimental import pallas as pl
from jax.experimental.pallas import tpu as pltpu

_SUBLANE = 8
_NEG = -1e30  # finite sentinel: exp(-1e30 - m) == 0, no inf-inf NaNs


def _round_up(x, m):
    return ((x + m - 1) // m) * m


def trpo_forward_kernel(x_ref, w1_ref, b1_ref, w2_ref, b2_ref, out_ref):
    """Fused MLP + log-softmax on one (TB, S_pad) batch tile."""
    # ---- layer 1 on the MXU (S padded to 8 with zero rows in W1 -> exact) ---
    h = jnp.dot(x_ref[...], w1_ref[...], preferred_element_type=jnp.float32)
    h = jnp.maximum(h + b1_ref[...], 0.0)                      # ReLU

    # ---- layer 2 on the MXU --------------------------------------------------
    # Padded action lanes get bias -1e30 (their W2 columns are zero), so they
    # contribute exactly 0 to the softmax denominator -- no in-kernel mask.
    logits = jnp.dot(h, w2_ref[...], preferred_element_type=jnp.float32) + b2_ref[...]

    # Numerically stable log-softmax over the action axis (PyTorch dim=1).
    m = jnp.max(logits, axis=-1, keepdims=True)
    z = logits - m
    lse = jnp.log(jnp.sum(jnp.exp(z), axis=-1, keepdims=True))
    out_ref[...] = z - lse                                     # [TB, A_pad] log-probs


def prepare_params(w1, b1, w2, b2):
    """One-time (per policy update) cast/pad of the weights.

    w1: [S, H], b1: [H], w2: [H, A], b2: [A]  ->
      w1p: [S_pad, H] (zero rows), b1r: [1, H],
      w2p: [H, A_pad] (zero cols), b2p: [1, A_pad] (-1e30 in padded cols).
    """
    S, H = w1.shape
    A = w2.shape[1]
    S_pad = _round_up(S, _SUBLANE)
    A_pad = _round_up(A, _SUBLANE)

    w1p = jnp.pad(w1.astype(jnp.float32), ((0, S_pad - S), (0, 0)))
    b1r = b1.astype(jnp.float32).reshape(1, H)
    w2p = jnp.pad(w2.astype(jnp.float32), ((0, 0), (0, A_pad - A)))
    b2p = jnp.pad(b2.astype(jnp.float32).reshape(1, A), ((0, 0), (0, A_pad - A)),
                  constant_values=_NEG)
    return w1p, b1r, w2p, b2p


@functools.partial(jax.jit, static_argnames=("n_actions", "block_batch"))
def trpo_forward(states, w1p, b1r, w2p, b2p, *, n_actions, block_batch=2048):
    """states: [B, S] -> log-probabilities [B, n_actions]."""
    B, S = states.shape
    S_pad, H = w1p.shape
    A_pad = w2p.shape[1]

    x = states.astype(jnp.float32)
    if S_pad != S:
        x = jnp.pad(x, ((0, 0), (0, S_pad - S)))   # feature pad only; no batch pad

    # Batch tile: multiple of 8, capped so there are >=2 grid steps whenever
    # possible (keeps both v7x TensorCores busy; harmless on v5e/v6e).
    TB = max(_SUBLANE, min(block_batch, _round_up(pl.cdiv(B, 2), _SUBLANE)))
    grid = (pl.cdiv(B, TB),)   # ragged last block: OOB output rows are dropped

    out = pl.pallas_call(
        trpo_forward_kernel,
        out_shape=jax.ShapeDtypeStruct((B, A_pad), jnp.float32),
        grid=grid,
        in_specs=[
            pl.BlockSpec((TB, S_pad), lambda i: (i, 0)),     # streamed batch tile
            pl.BlockSpec((S_pad, H), lambda i: (0, 0)),      # W1 VMEM-resident
            pl.BlockSpec((1, H), lambda i: (0, 0)),          # b1 resident
            pl.BlockSpec((H, A_pad), lambda i: (0, 0)),      # W2 resident
            pl.BlockSpec((1, A_pad), lambda i: (0, 0)),      # b2 resident
        ],
        out_specs=pl.BlockSpec((TB, A_pad), lambda i: (i, 0)),
        compiler_params=pltpu.CompilerParams(
            dimension_semantics=("parallel",),               # shard batch across TCs (v7x)
        ),
    )(x, w1p, b1r, w2p, b2p)

    return out[:, :n_actions]


def init_params(key, state_dim, hidden_size, n_actions):
    """Deterministic init mirroring PyTorch Linear's U(-1/sqrt(fan_in), 1/sqrt(fan_in))."""
    k1, k2, k3, k4 = jax.random.split(key, 4)
    lim1 = 1.0 / jnp.sqrt(jnp.float32(state_dim))
    lim2 = 1.0 / jnp.sqrt(jnp.float32(hidden_size))
    w1 = jax.random.uniform(k1, (state_dim, hidden_size), jnp.float32, -lim1, lim1)
    b1 = jax.random.uniform(k2, (hidden_size,), jnp.float32, -lim1, lim1)
    w2 = jax.random.uniform(k3, (hidden_size, n_actions), jnp.float32, -lim2, lim2)
    b2 = jax.random.uniform(k4, (n_actions,), jnp.float32, -lim2, lim2)
    return w1, b1, w2, b2


def _reference(states, w1, b1, w2, b2):
    h = jnp.maximum(states @ w1 + b1, 0.0)
    return jax.nn.log_softmax(h @ w2 + b2, axis=-1)


if __name__ == "__main__":
    state_dim = 4          # state_shape = (4,)
    hidden_size = 32
    n_actions = 6

    key = jax.random.PRNGKey(0)
    k_x, k_p, k_big = jax.random.split(key, 3)
    w1, b1, w2, b2 = init_params(k_p, state_dim, hidden_size, n_actions)
    w1p, b1r, w2p, b2p = prepare_params(w1, b1, w2, b2)   # hoisted weight prep

    # --- small batch (module-scale example) ---------------------------------
    batch = 8
    states = jax.random.normal(k_x, (batch, state_dim), jnp.float32)
    log_probs = trpo_forward(states, w1p, b1r, w2p, b2p, n_actions=n_actions)
    log_probs = jax.block_until_ready(log_probs)

    ref = _reference(states, w1, b1, w2, b2)
    assert log_probs.shape == (batch, n_actions)
    assert jnp.allclose(log_probs, ref, atol=1e-5, rtol=1e-5)
    assert jnp.allclose(jnp.sum(jnp.exp(log_probs), axis=-1), 1.0, atol=1e-4)

    # --- rollout-sized batch: exercises tiling + ragged last block -----------
    big_batch = 2000       # 2000 % 512 != 0 -> last grid block is ragged
    big_states = jax.random.normal(k_big, (big_batch, state_dim), jnp.float32)
    big_lp = trpo_forward(big_states, w1p, b1r, w2p, b2p,
                          n_actions=n_actions, block_batch=512)
    big_lp = jax.block_until_ready(big_lp)
    big_ref = _reference(big_states, w1, b1, w2, b2)
    assert big_lp.shape == (big_batch, n_actions)
    assert jnp.allclose(big_lp, big_ref, atol=1e-5, rtol=1e-5)
    assert jnp.allclose(jnp.sum(jnp.exp(big_lp), axis=-1), 1.0, atol=1e-4)

    # TODO(synk): act()'s host-side categorical sampling (numpy RNG) stays outside the kernel.
    print("KERNEL_OK")
</pallas_src>

<mosaic_0001>
module attributes {stable_mosaic.version = 11 : i64} {
  func.func @trpo_forward_kernel(%arg0: i32, %arg1: memref<8x8xf32, #tpu.memory_space<vmem>>, %arg2: memref<8x32xf32, #tpu.memory_space<vmem>>, %arg3: memref<1x32xf32, #tpu.memory_space<vmem>>, %arg4: memref<32x8xf32, #tpu.memory_space<vmem>>, %arg5: memref<1x8xf32, #tpu.memory_space<vmem>>, %arg6: memref<8x8xf32, #tpu.memory_space<vmem>>) attributes {dimension_semantics = [#tpu.dimension_semantics<parallel>], iteration_bounds = array<i64: 1>, scalar_prefetch = 0 : i64, scratch_operands = 0 : i64, tpu.core_type = #tpu.core_type<tc>, window_params = [{transform_indices = @transform_0, window_bounds = array<i64: 8, 8>}, {pipeline_mode = #tpu.pipeline_mode<synchronous>, transform_indices = @transform_1, window_bounds = array<i64: 8, 32>}, {pipeline_mode = #tpu.pipeline_mode<synchronous>, transform_indices = @transform_2, window_bounds = array<i64: 1, 32>}, {pipeline_mode = #tpu.pipeline_mode<synchronous>, transform_indices = @transform_3, window_bounds = array<i64: 32, 8>}, {pipeline_mode = #tpu.pipeline_mode<synchronous>, transform_indices = @transform_4, window_bounds = array<i64: 1, 8>}, {transform_indices = @transform_5, window_bounds = array<i64: 8, 8>}]} {
    %c0 = arith.constant 0 : index
    %c0_0 = arith.constant 0 : index
    %0 = vector.load %arg1[%c0, %c0_0] : memref<8x8xf32, #tpu.memory_space<vmem>>, vector<8x8xf32>
    %c0_1 = arith.constant 0 : index
    %c0_2 = arith.constant 0 : index
    %1 = vector.load %arg2[%c0_1, %c0_2] : memref<8x32xf32, #tpu.memory_space<vmem>>, vector<8x32xf32>
    %cst = arith.constant dense<0.000000e+00> : vector<8x32xf32>
    %2 = tpu.matmul %0, %1, %cst {dimension_numbers = #tpu.dot_dimension_numbers<[1], [0], [0], [1], [0, 0, 1, 1], [], []>} : vector<8x8xf32>, vector<8x32xf32>, vector<8x32xf32> -> vector<8x32xf32>
    %c0_3 = arith.constant 0 : index
    %c0_4 = arith.constant 0 : index
    %3 = vector.load %arg3[%c0_3, %c0_4] : memref<1x32xf32, #tpu.memory_space<vmem>>, vector<1x32xf32>
    %4 = vector.broadcast %3 : vector<1x32xf32> to vector<8x32xf32>
    %5 = arith.addf %2, %4 : vector<8x32xf32>
    %cst_5 = arith.constant 0.000000e+00 : f32
    %6 = vector.broadcast %cst_5 : f32 to vector<8x32xf32>
    %7 = arith.maximumf %5, %6 : vector<8x32xf32>
    %c0_6 = arith.constant 0 : index
    %c0_7 = arith.constant 0 : index
    %8 = vector.load %arg4[%c0_6, %c0_7] : memref<32x8xf32, #tpu.memory_space<vmem>>, vector<32x8xf32>
    %cst_8 = arith.constant dense<0.000000e+00> : vector<8x8xf32>
    %9 = tpu.matmul %7, %8, %cst_8 {dimension_numbers = #tpu.dot_dimension_numbers<[1], [0], [0], [1], [0, 0, 1, 1], [], []>} : vector<8x32xf32>, vector<32x8xf32>, vector<8x8xf32> -> vector<8x8xf32>
    %c0_9 = arith.constant 0 : index
    %c0_10 = arith.constant 0 : index
    %10 = vector.load %arg5[%c0_9, %c0_10] : memref<1x8xf32, #tpu.memory_space<vmem>>, vector<1x8xf32>
    %11 = vector.broadcast %10 : vector<1x8xf32> to vector<8x8xf32>
    %12 = arith.addf %9, %11 : vector<8x8xf32>
    %cst_11 = arith.constant dense<0xFF800000> : vector<8xf32>
    %13 = vector.multi_reduction <maximumf>, %12, %cst_11 [1] : vector<8x8xf32> to vector<8xf32>
    %14 = vector.shape_cast %13 : vector<8xf32> to vector<8x1xf32>
    %15 = vector.broadcast %14 : vector<8x1xf32> to vector<8x8xf32>
    %16 = arith.subf %12, %15 : vector<8x8xf32>
    %17 = math.exp %16 : vector<8x8xf32>
    %cst_12 = arith.constant dense<0.000000e+00> : vector<8xf32>
    %18 = vector.multi_reduction <add>, %17, %cst_12 [1] : vector<8x8xf32> to vector<8xf32>
    %19 = vector.shape_cast %18 : vector<8xf32> to vector<8x1xf32>
    %20 = math.log %19 : vector<8x1xf32>
    %21 = vector.broadcast %20 : vector<8x1xf32> to vector<8x8xf32>
    %22 = arith.subf %16, %21 : vector<8x8xf32>
    %c0_13 = arith.constant 0 : index
    %c0_14 = arith.constant 0 : index
    %23 = vector.load %arg6[%c0_13, %c0_14] : memref<8x8xf32, #tpu.memory_space<vmem>>, vector<8x8xf32>
    tpu.vector_store %arg6[%c0_13, %c0_14], %22 {strides = array<i32>} : memref<8x8xf32, #tpu.memory_space<vmem>>, vector<8x8xf32>,
    return
  }
  func.func @transform_0(%arg0: i32) -> (i32, i32) {
    %c0_i32 = arith.constant 0 : i32
    %c0_i32_0 = arith.constant 0 : i32
    return %arg0, %c0_i32 : i32, i32
  }
  func.func @transform_1(%arg0: i32) -> (i32, i32) {
    %c0_i32 = arith.constant 0 : i32
    %c0_i32_0 = arith.constant 0 : i32
    %c0_i32_1 = arith.constant 0 : i32
    return %c0_i32, %c0_i32_0 : i32, i32
  }
  func.func @transform_2(%arg0: i32) -> (i32, i32) {
    %c0_i32 = arith.constant 0 : i32
    %c0_i32_0 = arith.constant 0 : i32
    %c0_i32_1 = arith.constant 0 : i32
    return %c0_i32, %c0_i32_0 : i32, i32
  }
  func.func @transform_3(%arg0: i32) -> (i32, i32) {
    %c0_i32 = arith.constant 0 : i32
    %c0_i32_0 = arith.constant 0 : i32
    %c0_i32_1 = arith.constant 0 : i32
    return %c0_i32, %c0_i32_0 : i32, i32
  }
  func.func @transform_4(%arg0: i32) -> (i32, i32) {
    %c0_i32 = arith.constant 0 : i32
    %c0_i32_0 = arith.constant 0 : i32
    %c0_i32_1 = arith.constant 0 : i32
    return %c0_i32, %c0_i32_0 : i32, i32
  }
  func.func @transform_5(%arg0: i32) -> (i32, i32) {
    %c0_i32 = arith.constant 0 : i32
    %c0_i32_0 = arith.constant 0 : i32
    return %arg0, %c0_i32 : i32, i32
  }
}

</mosaic_0001>

<bundles_post_ra>
// kernel: trpo_forward.1
= control target key start
LH: loop header
LB: loop body
LE: loop exit
PB: predicated region body
PF: predicated region fallthrough
CT: control target
= control target key end

     0   :  { %vm27_vm0 = vcmask 64512   ;;  %s210_s0 = inlined_call_operand.vmem [shape: f32[8,8], index: 0, kind: input, shape index: {}]   ;;  %s211_s1 = inlined_call_operand.vmem [shape: f32[8,32], index: 1, kind: input, shape index: {}]   ;;  %s212_s2 = inlined_call_operand.vmem [shape: f32[1,32], index: 2, kind: input, shape index: {}]   ;;  %s213_s3 = inlined_call_operand.vmem [shape: f32[32,8], index: 3, kind: input, shape index: {}]   ;;  %s214_s4 = inlined_call_operand.vmem [shape: f32[1,8], index: 4, kind: input, shape index: {}]   ;;  %s215_s5 = inlined_call_operand.hbm [shape: f32[8,8], index: 5, kind: output, shape index: {}]  }
   0x1   :  { %v22_v0 = vld [vmem:[%s211_s1] sm:$0xff]  ;;  %v55_v2 = vld [vmem:[%s213_s3 + $0x18] sm:$0xff] }
   0x2   :  { %v21_v1 = vld [vmem:[%s210_s0] sm:$0xff]  ;;  %46 = vmatpush.msra.mxu0 %v22_v0  ;;  %76 = vmatpush.msra.mxu1 %v55_v2 }
   0x3   :  { %113 = vmatmul.msk.f32.vlgmr.msra.gmra.mxu0 %vm27_vm0, %v21_v1 }
   0x4   :  { %10 = vsyncpa [#allocation3], 0  ;;  %v54_v3 = vld [vmem:[%s213_s3 + $0x10] sm:$0xff]  ;;  %v53_v4 = vld [vmem:[%s213_s3 + $0x8] sm:$0xff]  ;;  %vm60_vm1 = vcmask 261120   ;;  %s104_s8 = sshll.u32 %s215_s5, 4  ;;  %s105_s8 = int_to_ptr.hbm [resolvable:$true] %s104_s8 }
   0x5   :  { %77 = vmatpush.msra.mxu1 %v54_v3  ;;  %v52_v5 = vld [vmem:[%s213_s3] sm:$0xff] }
   0x6   :  { %v116_v6 = vld [vmem:[%s212_s2] ss:$0 sm:$0xff]  ;;  %s148_s2 = smov [#allocation2]  }
   0x7   :  { %78 = vmatpush.msra.mxu1 %v53_v4  ;;  %v117_v10 = vld [vmem:[%s214_s4] ss:$0 sm:$0xff]  ;;  %s102_s3 = sshll.u32 %s148_s2, 4  ;;  %s103_s3 = int_to_ptr.vmem [resolvable:$true] %s102_s3 }
   0x9   :  { %79 = vmatpush.msra.mxu1 %v52_v5 }
  0x80   :  { %v48_v7 = vpop.f32.mrf.mxu0 }
  0x81   :  { %v49_v8 = vadd.f32 %v116_v6, %v48_v7 }
  0x83   :  { %v51_v9 = vmax.f32 %v49_v8, 0.0 }
  0x85   :  { %114 = vmatmul.msk.f32.vlgmr.msra.gmra.mxu1 %vm60_vm1, %v51_v9 }
 0x102   :  { %v81_v11 = vpop.f32.mrf.mxu1 }
 0x103   :  { %v82_v12 = vadd.f32 %v117_v10, %v81_v11 }
 0x105   :  { %v84_v13 = vsel %vm27_vm0, %v82_v12, -inf }
 0x106   :  { %85 = vmax.xlane.f32.xlu0 %v84_v13 }
 0x179   :  { %v86_v14 = vpop.xlane.xlu0 %85 }
 0x17a   :  { %v87_v15 = vsub.f32 %v82_v12, %v86_v14 }
 0x17c   :  { %v88_v16 = vmul.f32 1.442695, %v87_v15 }
 0x17e   :  { %118 = vpow2.f32 %v88_v16 }
 0x184   :  { %v119_v17 = vpop.eup %118 }
 0x185   :  { %v90_v18 = vsel %vm27_vm0, %v119_v17, 0.0 }
 0x186   :  { %91 = vadd.xlane.f32.xlu0 %v90_v18 }
 0x1f9   :  { %v92_v19 = vpop.xlane.xlu0 %91 }
 0x1fa   :  { %120 = vlog2.f32 %v92_v19 }
 0x200   :  { %v121_v20 = vpop.eup %120 }
 0x201   :  { %v94_v21 = vmul.f32 0.6931472, %v121_v20 }
 0x203   :  { %v95_v22 = vsub.f32 %v87_v15, %v94_v21 }
 0x205   :  { %96 = vst.msk [vmem:[#allocation2] sm:$0xff] %vm27_vm0, %v95_v22 }
 0x206   :  { %107 = dma.vmem_to_hbm [thread:$0]  %s103_s3, 128, %s105_s8, [#allocation3]  }
 0x207   :  { %146 = dma.done.wait [#allocation3], 128  }
 0x208   :  { %147 = vsyncadd [#allocation3], 4294967168 }
 0x209   :  { %112 = vsyncpa [#allocation3], 1 }

</bundles_post_ra>
